<compile_context>
chip_gen: v7x
topology: tpu7x:2x2x1
jax: 0.10.0
libtpu: 0.0.40
codegen_flags: <defaults>
</compile_context>

<pallas_src>
import functools

import jax
import jax.numpy as jnp
from jax.experimental import pallas as pl
from jax.experimental.pallas import tpu as pltpu


def _round_up(x, m):
    return (x + m - 1) // m * m


def _gaussian_kernel(x_ref, w_ref, b_ref, noise_ref, *out_refs, z_dim, packed):
    zp = noise_ref.shape[-1]  # padded z dim (multiple of 128)

    # Fused linear: [bb, in] @ [in, 2*zp]; bf16 operands, f32 MXU accumulation.
    x_bf = x_ref[...].astype(jnp.bfloat16)
    pre = jnp.dot(x_bf, w_ref[...], preferred_element_type=jnp.float32)
    pre = pre + b_ref[...]  # (1, 2*zp) f32 bias broadcast over rows

    mu = pre[:, :zp]                        # tile-aligned static slice
    var = jnp.logaddexp(pre[:, zp:], 0.0)   # numerically stable softplus (f32)

    std = jnp.sqrt(var + 1e-10)
    z = mu + noise_ref[...] * std           # reparameterization (f32)

    if packed:
        # Single lane-dense [bb, 128] output: mu | var | z | zero pad.
        out_ref, = out_refs
        bb = mu.shape[0]
        pad_w = out_ref.shape[-1] - 3 * z_dim
        pieces = [mu[:, :z_dim], var[:, :z_dim], z[:, :z_dim]]
        if pad_w > 0:
            pieces.append(jnp.zeros((bb, pad_w), jnp.float32))
        out_ref[...] = jnp.concatenate(pieces, axis=-1).astype(out_ref.dtype)
    else:
        mu_ref, var_ref, z_ref = out_refs
        mu_ref[...] = mu.astype(mu_ref.dtype)
        var_ref[...] = var.astype(var_ref.dtype)
        z_ref[...] = z.astype(z_ref.dtype)


def _pick_block_b(block_b, B, in_dim, z_pad, out_w, n_out,
                  budget_bytes=24 * 1024 * 1024):
    """Batch tile <= block_b: fits a conservative VMEM budget, >=2 grid steps."""
    bb = min(_round_up(block_b, 8), _round_up(B, 8))
    if B > 8:
        # Keep at least 2 grid steps so the "parallel" axis can shard across
        # both TensorCores on v7x (and amortizes nothing measurable elsewhere).
        bb = min(bb, _round_up((B + 1) // 2, 8))
    # Resident weight/bias: Pallas double-buffers even constant-index blocks.
    weight_bytes = 2 * (in_dim * (2 * z_pad) * 2 + (2 * z_pad) * 4)

    def per_step(bb_):
        return (2 * bb_ * in_dim * 4            # f32 x tile, double-buffered
                + 2 * bb_ * z_pad * 4           # f32 noise tile, double-buffered
                + 2 * n_out * bb_ * out_w * 4)  # f32 output tiles, double-buffered

    while bb > 8 and weight_bytes + per_step(bb) > budget_bytes:
        bb = max(8, _round_up(bb // 2, 8))
    return bb


def fuse_gaussian_params(w_mu, b_mu, w_var, b_var):
    """Build the fused, padded operands once (weights are static per model).

    Returns (w_fused_bf16 [in_dim, 2*z_pad], b_fused_f32 [1, 2*z_pad]).
    """
    in_dim, z_dim = w_mu.shape
    z_pad = _round_up(z_dim, 128)
    w = jnp.zeros((in_dim, 2 * z_pad), jnp.float32)
    w = w.at[:, :z_dim].set(w_mu).at[:, z_pad:z_pad + z_dim].set(w_var)
    b = jnp.zeros((1, 2 * z_pad), jnp.float32)
    b = b.at[:, :z_dim].set(b_mu).at[:, z_pad:z_pad + z_dim].set(b_var)
    return w.astype(jnp.bfloat16), b


@functools.partial(jax.jit, static_argnames=("z_dim", "block_b"))
def gaussian_forward(x, w_fused, b_fused, noise_key, *, z_dim, block_b=1024):
    """x: [B, in_dim] f32; fused params from fuse_gaussian_params; noise_key:
    jax PRNG key for the reparameterization noise.

    Returns (mu, var, z), each [B, z_dim] f32, matching Gaussian.forward.
    """
    B, in_dim = x.shape
    z_pad = w_fused.shape[1] // 2
    assert z_pad == _round_up(z_dim, 128), "fused params / z_dim mismatch"

    packed = (3 * z_dim) <= 128
    out_w = 128 if packed else z_pad
    n_out = 1 if packed else 3

    bb = _pick_block_b(block_b, B, in_dim, z_pad, out_w, n_out)
    B_pad = _round_up(B, bb)
    if B_pad != B:
        x = jnp.pad(x, ((0, B_pad - B), (0, 0)))

    # Standard-normal noise (randn_like semantics), generated at padded shape.
    noise = jax.random.normal(noise_key, (B_pad, z_pad), jnp.float32)

    grid = (B_pad // bb,)
    x_spec = pl.BlockSpec((bb, in_dim), lambda i: (i, 0))
    w_spec = pl.BlockSpec((in_dim, 2 * z_pad), lambda i: (0, 0))
    b_spec = pl.BlockSpec((1, 2 * z_pad), lambda i: (0, 0))
    n_spec = pl.BlockSpec((bb, z_pad), lambda i: (i, 0))
    o_spec = pl.BlockSpec((bb, out_w), lambda i: (i, 0))
    out_sds = jax.ShapeDtypeStruct((B_pad, out_w), jnp.float32)

    if packed:
        out_shape = out_sds
        out_specs = o_spec
    else:
        out_shape = (out_sds, out_sds, out_sds)
        out_specs = [o_spec, o_spec, o_spec]

    cost = pl.CostEstimate(
        flops=2 * B_pad * in_dim * (2 * z_pad),
        transcendentals=2 * B_pad * z_pad,  # softplus exp/log
        bytes_accessed=(B_pad * in_dim * 4 + w_fused.size * 2 + b_fused.size * 4
                        + B_pad * z_pad * 4 + n_out * B_pad * out_w * 4),
    )

    kernel = functools.partial(_gaussian_kernel, z_dim=z_dim, packed=packed)

    out = pl.pallas_call(
        kernel,
        out_shape=out_shape,
        grid_spec=pltpu.PrefetchScalarGridSpec(
            num_scalar_prefetch=0,
            grid=grid,
            in_specs=[x_spec, w_spec, b_spec, n_spec],
            out_specs=out_specs,
        ),
        compiler_params=pltpu.CompilerParams(
            dimension_semantics=("parallel",),
            vmem_limit_bytes=32 * 1024 * 1024,
        ),
        cost_estimate=cost,
    )(x, w_fused, b_fused, noise)

    if packed:
        mu = out[:B, 0 * z_dim:1 * z_dim]
        var = out[:B, 1 * z_dim:2 * z_dim]
        z = out[:B, 2 * z_dim:3 * z_dim]
    else:
        mu, var, z = (o[:B, :z_dim] for o in out)
    return mu, var, z


def _init_linear(key, in_dim, z_dim):
    # Deterministic stand-in for PyTorch's default Linear init:
    # uniform(-1/sqrt(in_dim), 1/sqrt(in_dim)) for weight and bias.
    kw, kb = jax.random.split(key)
    bound = 1.0 / jnp.sqrt(jnp.float32(in_dim))
    w = jax.random.uniform(kw, (in_dim, z_dim), jnp.float32, -bound, bound)
    b = jax.random.uniform(kb, (z_dim,), jnp.float32, -bound, bound)
    return w, b


if __name__ == "__main__":
    key = jax.random.PRNGKey(0)
    k_x, k_mu, k_var, k_noise = jax.random.split(key, 4)

    B, in_dim, z_dim = 64, 32, 16
    x = jax.random.normal(k_x, (B, in_dim), jnp.float32)
    w_mu, b_mu = _init_linear(k_mu, in_dim, z_dim)
    w_var, b_var = _init_linear(k_var, in_dim, z_dim)

    w_fused, b_fused = fuse_gaussian_params(w_mu, b_mu, w_var, b_var)
    mu, var, z = gaussian_forward(x, w_fused, b_fused, k_noise, z_dim=z_dim)
    jax.block_until_ready((mu, var, z))

    # Pure-JAX reference with the same bf16-rounded matmul operands.
    hp = jax.lax.Precision.HIGHEST
    xb = x.astype(jnp.bfloat16).astype(jnp.float32)
    wmu_b = w_mu.astype(jnp.bfloat16).astype(jnp.float32)
    wvar_b = w_var.astype(jnp.bfloat16).astype(jnp.float32)
    mu_ref = jnp.dot(xb, wmu_b, precision=hp) + b_mu
    var_ref = jax.nn.softplus(jnp.dot(xb, wvar_b, precision=hp) + b_var)

    assert mu.shape == (B, z_dim) and var.shape == (B, z_dim) and z.shape == (B, z_dim)
    assert bool(jnp.allclose(mu, mu_ref, atol=2e-3, rtol=1e-3)), "mu mismatch"
    assert bool(jnp.allclose(var, var_ref, atol=2e-3, rtol=1e-3)), "var mismatch"
    assert bool(jnp.all(var > 0)), "softplus output must be positive"

    # z uses wrapper-generated N(0,1) noise (randn_like semantics; values
    # differ from torch.randn).  Verify the reparameterization structure:
    # implied noise is finite and approximately standard normal.
    noise_implied = (z - mu) / jnp.sqrt(var + 1e-10)
    assert bool(jnp.all(jnp.isfinite(noise_implied)))
    assert float(jnp.abs(noise_implied.mean())) < 0.25
    assert 0.7 < float(noise_implied.std()) < 1.3

    print("KERNEL_OK")
</pallas_src>

<mosaic_0001>
module attributes {stable_mosaic.version = 11 : i64} {
  func.func @_gaussian_kernel(%arg0: i32, %arg1: memref<32x32xf32, #tpu.memory_space<vmem>>, %arg2: memref<32x256xbf16, #tpu.memory_space<vmem>>, %arg3: memref<1x256xf32, #tpu.memory_space<vmem>>, %arg4: memref<32x128xf32, #tpu.memory_space<vmem>>, %arg5: memref<32x128xf32, #tpu.memory_space<vmem>>) attributes {dimension_semantics = [#tpu.dimension_semantics<parallel>], iteration_bounds = array<i64: 2>, scalar_prefetch = 0 : i64, scratch_operands = 0 : i64, tpu.core_type = #tpu.core_type<tc>, window_params = [{transform_indices = @transform_0, window_bounds = array<i64: 32, 32>}, {pipeline_mode = #tpu.pipeline_mode<synchronous>, transform_indices = @transform_1, window_bounds = array<i64: 32, 256>}, {pipeline_mode = #tpu.pipeline_mode<synchronous>, transform_indices = @transform_2, window_bounds = array<i64: 1, 256>}, {transform_indices = @transform_3, window_bounds = array<i64: 32, 128>}, {transform_indices = @transform_4, window_bounds = array<i64: 32, 128>}]} {
    %c0 = arith.constant 0 : index
    %c0_0 = arith.constant 0 : index
    %0 = vector.load %arg1[%c0, %c0_0] : memref<32x32xf32, #tpu.memory_space<vmem>>, vector<32x32xf32>
    %1 = arith.truncf %0 : vector<32x32xf32> to vector<32x32xbf16>
    %c0_1 = arith.constant 0 : index
    %c0_2 = arith.constant 0 : index
    %2 = vector.load %arg2[%c0_1, %c0_2] : memref<32x256xbf16, #tpu.memory_space<vmem>>, vector<32x256xbf16>
    %cst = arith.constant dense<0.000000e+00> : vector<32x256xf32>
    %3 = tpu.matmul %1, %2, %cst {dimension_numbers = #tpu.dot_dimension_numbers<[1], [0], [0], [1], [0, 0, 1, 1], [], []>} : vector<32x32xbf16>, vector<32x256xbf16>, vector<32x256xf32> -> vector<32x256xf32>
    %c0_3 = arith.constant 0 : index
    %c0_4 = arith.constant 0 : index
    %4 = vector.load %arg3[%c0_3, %c0_4] : memref<1x256xf32, #tpu.memory_space<vmem>>, vector<1x256xf32>
    %5 = vector.broadcast %4 : vector<1x256xf32> to vector<32x256xf32>
    %6 = arith.addf %3, %5 : vector<32x256xf32>
    %7 = vector.extract_strided_slice %6 {offsets = [0, 0], sizes = [32, 128], strides = [1, 1]} : vector<32x256xf32> to vector<32x128xf32>
    %8 = vector.extract_strided_slice %6 {offsets = [0, 128], sizes = [32, 128], strides = [1, 1]} : vector<32x256xf32> to vector<32x128xf32>
    %cst_5 = arith.constant 0.000000e+00 : f32
    %9 = vector.broadcast %cst_5 : f32 to vector<32x128xf32>
    %10 = arith.maximumf %8, %9 : vector<32x128xf32>
    %11 = vector.broadcast %cst_5 : f32 to vector<32x128xf32>
    %12 = arith.subf %8, %11 : vector<32x128xf32>
    %13 = arith.cmpf one, %12, %12 : vector<32x128xf32>
    %14 = vector.broadcast %cst_5 : f32 to vector<32x128xf32>
    %15 = arith.addf %8, %14 : vector<32x128xf32>
    %16 = math.absf %12 : vector<32x128xf32>
    %cst_6 = arith.constant 0.000000e+00 : f32
    %17 = vector.broadcast %cst_6 : f32 to vector<32x128xf32>
    %18 = arith.subf %17, %16 : vector<32x128xf32>
    %19 = math.exp %18 : vector<32x128xf32>
    %20 = math.log1p %19 : vector<32x128xf32>
    %21 = arith.addf %10, %20 : vector<32x128xf32>
    %22 = arith.select %13, %15, %21 : vector<32x128xi1>, vector<32x128xf32>
    %cst_7 = arith.constant 1.000000e-10 : f32
    %23 = vector.broadcast %cst_7 : f32 to vector<32x128xf32>
    %24 = arith.addf %22, %23 : vector<32x128xf32>
    %25 = math.sqrt %24 : vector<32x128xf32>
    %c0_8 = arith.constant 0 : index
    %c0_9 = arith.constant 0 : index
    %26 = vector.load %arg4[%c0_8, %c0_9] : memref<32x128xf32, #tpu.memory_space<vmem>>, vector<32x128xf32>
    %27 = arith.mulf %26, %25 : vector<32x128xf32>
    %28 = arith.addf %7, %27 : vector<32x128xf32>
    %29 = vector.extract_strided_slice %7 {offsets = [0, 0], sizes = [32, 16], strides = [1, 1]} : vector<32x128xf32> to vector<32x16xf32>
    %30 = vector.extract_strided_slice %22 {offsets = [0, 0], sizes = [32, 16], strides = [1, 1]} : vector<32x128xf32> to vector<32x16xf32>
    %31 = vector.extract_strided_slice %28 {offsets = [0, 0], sizes = [32, 16], strides = [1, 1]} : vector<32x128xf32> to vector<32x16xf32>
    %cst_10 = arith.constant 0.000000e+00 : f32
    %32 = vector.broadcast %cst_10 : f32 to vector<32x80xf32>
    %33 = tpu.concatenate %29, %30, %31, %32 in 1 : vector<32x16xf32>, vector<32x16xf32>, vector<32x16xf32>, vector<32x80xf32> -> vector<32x128xf32>
    %c0_11 = arith.constant 0 : index
    %c0_12 = arith.constant 0 : index
    %34 = vector.load %arg5[%c0_11, %c0_12] : memref<32x128xf32, #tpu.memory_space<vmem>>, vector<32x128xf32>
    tpu.vector_store %arg5[%c0_11, %c0_12], %33 {strides = array<i32>} : memref<32x128xf32, #tpu.memory_space<vmem>>, vector<32x128xf32>,
    return
  }
  func.func @transform_0(%arg0: i32) -> (i32, i32) {
    %c0_i32 = arith.constant 0 : i32
    %c0_i32_0 = arith.constant 0 : i32
    return %arg0, %c0_i32 : i32, i32
  }
  func.func @transform_1(%arg0: i32) -> (i32, i32) {
    %c0_i32 = arith.constant 0 : i32
    %c0_i32_0 = arith.constant 0 : i32
    %c0_i32_1 = arith.constant 0 : i32
    return %c0_i32, %c0_i32_0 : i32, i32
  }
  func.func @transform_2(%arg0: i32) -> (i32, i32) {
    %c0_i32 = arith.constant 0 : i32
    %c0_i32_0 = arith.constant 0 : i32
    %c0_i32_1 = arith.constant 0 : i32
    return %c0_i32, %c0_i32_0 : i32, i32
  }
  func.func @transform_3(%arg0: i32) -> (i32, i32) {
    %c0_i32 = arith.constant 0 : i32
    %c0_i32_0 = arith.constant 0 : i32
    return %arg0, %c0_i32 : i32, i32
  }
  func.func @transform_4(%arg0: i32) -> (i32, i32) {
    %c0_i32 = arith.constant 0 : i32
    %c0_i32_0 = arith.constant 0 : i32
    return %arg0, %c0_i32 : i32, i32
  }
}

</mosaic_0001>

<bundles_post_ra>
// kernel: gaussian_forward.1
= control target key start
LH: loop header
LB: loop body
LE: loop exit
PB: predicated region body
PF: predicated region fallthrough
CT: control target
= control target key end

     0   :  { %s660_s15 = smov 0   ;;  %s772_s0 = inlined_call_operand.vmem [shape: f32[64,32], index: 0, kind: input, shape index: {}]   ;;  %s773_s1 = inlined_call_operand.vmem [shape: bf16[32,256], index: 1, kind: input, shape index: {}]   ;;  %s774_s2 = inlined_call_operand.vmem [shape: f32[1,256], index: 2, kind: input, shape index: {}]   ;;  %s775_s3 = inlined_call_operand.vmem [shape: f32[64,128], index: 3, kind: input, shape index: {}]   ;;  %s776_s4 = inlined_call_operand.vmem [shape: f32[64,128], index: 4, kind: output, shape index: {}]  }
   0x1 LB: > { %s560_s16 = sadd.s32 4294967295, %s630_s15   ;;  %p564_p0 = scmp.ge.s32.totalorder %s630_s15, 1  ;;  %s630_s15 = sphi %s660_s15, %s14_s15  }
   0x2   : > { %p174_p1 = scmp.lt.s32.totalorder %s630_s15, 3 }
   0x4   : > { %p175_p2 = pnand %p564_p0, %p174_p1 }
   0x5   : > { %v594_v0 = vld [vmem:[%s773_s1 + $0x4] ss:$8 sps:$4 sm:$0xff] (!%p175_p2)   ;;  %s565_s19 = sshll.u32 (!%p175_p2), %s560_s16, 2  ;;  %v596_v1 = vld [vmem:[%s773_s1] ss:$8 sps:$4 sm:$0xff] (!%p175_p2)   ;;  %v632_v2 = vmov (!%p175_p2), 0   ;;  %v236_v11 = vlaneseq (!%p175_p2) }
   0x6   : > { %178 = sbr.rel (%p175_p2) target bundleno = 415 (0x19f), region = 36  ;;  %305 = vmatprep.mubr.bf16.mxu0 (!%p175_p2), %v632_v2  ;;  %315 = vmatprep.mubr.bf16.mxu1 (!%p175_p2), %v632_v2  ;;  %p206_p3 = scmp.lt.s32.totalorder (!%p175_p2), %s565_s19, 7  ;;  %v597_v3 = vld [vmem:[%s773_s1 + $0x14] ss:$8 sps:$4 sm:$0xff] (!%p175_p2)   ;;  %v599_v4 = vld [vmem:[%s773_s1 + $0x10] ss:$8 sps:$4 sm:$0xff] (!%p175_p2)  }
   0x7   : > { %273 = vmatprep.subr.bf16.mxu0 (!%p175_p2), %v594_v0  ;;  %579 = vmatprep.subr.bf16.mxu1 (!%p175_p2), %v594_v0  ;;  %vm266_vm0 = vcmask (!%p175_p2), 261120   ;;  %v688_v12 = vshrl.u32 (!%p175_p2), %v236_v11, 7  ;;  %v694_v14 = vld [vmem:[%s774_s2] sm:$0x3] (!%p175_p2)  ;;  %s633_s6 = smov (!%p175_p2), 16   ;;  %s634_s10 = smov (!%p175_p2), 32  }
   0x8   : > { %274 = vmatpush1.bf16.msra.mxu0 (!%p175_p2), %v596_v1  ;;  %581 = vmatpush1.bf16.msra.mxu1 (!%p175_p2), %v596_v1 }
   0x9   : > { %275 = vmatprep.subr.bf16.mxu0 (!%p175_p2), %v597_v3  ;;  %580 = vmatprep.subr.bf16.mxu1 (!%p175_p2), %v597_v3  ;;  %v242_v13 = vsub.s32 (!%p175_p2), 1, %v688_v12 }
   0xb   : > { %v243_v15 = vrot.slane (!%p175_p2), %v694_v14, %v242_v13 }
   0xc   : > { %276 = vmatpush1.bf16.msra.mxu0 (!%p175_p2), %v599_v4  ;;  %582 = vmatpush1.bf16.msra.mxu1 (!%p175_p2), %v599_v4 }
   0xd   : > { %s778_s19 = smov (!%p206_p3, %s565_s19), 7 }
   0xe   : > { %s680_s26 = sshll.u32 %s778_s19, 3 }
   0xf   : > { %s209_s29 = scalar_lea.vmem %s772_s0, %s680_s26  ;;  %s742_s9 = scalar_lea.vmem %s775_s3, %s680_s26 }
  0x10   : > { %v224_v5 = vld [vmem:[%s209_s29] sm:$0xff]  ;;  %v225_v6 = vld [vmem:[%s209_s29 + $0x8] sm:$0xff]  ;;  %v226_v7 = vld [vmem:[%s209_s29 + $0x10] sm:$0xff]  ;;  %s221_s13 = scalar_lea.vmem %s776_s4, %s680_s26 }
  0x11   : > { %v228_v8 = vpack.c.bf16 %v225_v6, %v224_v5  ;;  %v227_v9 = vld [vmem:[%s209_s29 + $0x18] sm:$0xff] }
  0x12   : > { %v229_v10 = vpack.c.bf16 %v227_v9, %v226_v7 }
  0x13   : > { %575 = vmatmul.mubr.msk.bf16.vlgmr.msra.gmra.mrb[0].mxu0 %vm266_vm0, %v228_v8 }
  0x14   : > { %576 = vmatmul.mubr.msk.bf16.vlgmr.msra.gmra.mrb[0].mxu1 %vm266_vm0, %v229_v10 }
  0xe6   : > { %v697_v16 = vpop.f32.mrb[0].mxu0 }
  0xe7   : > { %v699_v17 = vpop.f32.mrb[0].mxu1  ;;  %v309_v18 = vpop.f32.mrb[1].mxu0 }
  0xe8   : > { %v701_v19 = vadd.f32 %v309_v18, %v243_v15  ;;  %v319_v20 = vpop.f32.mrb[1].mxu1  ;;  %v703_v21 = vpop.f32.mrb[2].mxu0 }
  0xe9   : > { %v705_v22 = vadd.f32 %v319_v20, %v243_v15  ;;  %v707_v23 = vpop.f32.mrb[2].mxu1  ;;  %v313_v24 = vpop.f32.mrb[3].mxu0 }
  0xea   : > { %v338_v25 = vand.u32 2147483647, %v701_v19  ;;  %v710_v26 = vadd.f32 %v313_v24, %v243_v15  ;;  %v323_v27 = vpop.f32.mrb[3].mxu1  ;;  %v326_v60 = vmax.f32 %v701_v19, 0.0  ;;  %vm330_vm1 = vcmp.ne.f32.partialorder %v701_v19, %v701_v19 }
  0xeb   : > { %v340_v28 = vand.u32 2147483647, %v705_v22  ;;  %v713_v29 = vadd.f32 %v323_v27, %v243_v15  ;;  %v328_v59 = vmax.f32 %v705_v22, 0.0  ;;  %vm332_vm6 = vcmp.ne.f32.partialorder %v705_v22, %v705_v22 }
  0xec   : > { %v342_v30 = vsub.f32 0.0, %v338_v25  ;;  %v339_v31 = vand.u32 2147483647, %v710_v26  ;;  %v327_v2 = vmax.f32 %v710_v26, 0.0  ;;  %vm331_vm7 = vcmp.ne.f32.partialorder %v710_v26, %v710_v26 }
  0xed   : > { %v344_v32 = vsub.f32 0.0, %v340_v28  ;;  %v341_v33 = vand.u32 2147483647, %v713_v29  ;;  %v329_v20 = vmax.f32 %v713_v29, 0.0  ;;  %vm333_vm8 = vcmp.ne.f32.partialorder %v713_v29, %v713_v29 }
  0xee   : > { %v346_v34 = vmul.f32 1.442695, %v342_v30  ;;  %v343_v35 = vsub.f32 0.0, %v339_v31 }
  0xef   : > { %v350_v36 = vmul.f32 1.442695, %v344_v32  ;;  %v345_v37 = vsub.f32 0.0, %v341_v33 }
  0xf0   : > { %600 = vpow2.f32 %v346_v34  ;;  %v348_v38 = vmul.f32 1.442695, %v343_v35 }
  0xf1   : > { %602 = vpow2.f32 %v350_v36  ;;  %v352_v39 = vmul.f32 1.442695, %v345_v37  ;;  %v238_v36 = vsub.s32 0, %v688_v12 }
  0xf2   : > { %604 = vpow2.f32 %v348_v38 }
  0xf3   : > { %606 = vpow2.f32 %v352_v39  ;;  %v239_v37 = vrot.slane %v694_v14, %v238_v36 }
  0xfa   : > { %v601_v40 = vpop.eup %600 }
  0xfb   : > { %v603_v41 = vpop.eup %602  ;;  %v354_v42 = vadd.f32 1.0, %v601_v40  ;;  %v357_v48 = vmul.f32 -0.5, %v601_v40  ;;  %v360_v55 = vand.u32 2147483647, %v601_v40 }
  0xfc   : > { %v605_v43 = vpop.eup %604  ;;  %v372_v44 = vadd.f32 1.0, %v603_v41  ;;  %v375_v49 = vmul.f32 -0.5, %v603_v41  ;;  %v378_v54 = vand.u32 2147483647, %v603_v41 }
  0xfd   : > { %v607_v45 = vpop.eup %606  ;;  %608 = vlog2.f32 %v354_v42  ;;  %v363_v46 = vadd.f32 1.0, %v605_v43  ;;  %v366_v50 = vmul.f32 -0.5, %v605_v43  ;;  %v358_v52 = vadd.f32 1.0, %v357_v48 }
  0xfe   : > { %610 = vlog2.f32 %v372_v44  ;;  %v381_v47 = vadd.f32 1.0, %v607_v45  ;;  %v384_v51 = vmul.f32 -0.5, %v607_v45  ;;  %v376_v53 = vadd.f32 1.0, %v375_v49 }
  0xff   : > { %612 = vlog2.f32 %v363_v46  ;;  %v367_v56 = vadd.f32 1.0, %v366_v50  ;;  %v369_v57 = vand.u32 2147483647, %v605_v43  ;;  %v359_v0 = vmul.f32 %v601_v40, %v358_v52  ;;  %v431_v46 = vld [vmem:[%s742_s9 + $0x8] sm:$0xff] }
 0x100   : > { %614 = vlog2.f32 %v381_v47  ;;  %v385_v61 = vadd.f32 1.0, %v384_v51  ;;  %v387_v1 = vand.u32 2147483647, %v607_v45  ;;  %v377_v5 = vmul.f32 %v603_v41, %v376_v53  ;;  %v430_v41 = vld [vmem:[%s742_s9] sm:$0xff]  ;;  %v433_v53 = vld [vmem:[%s742_s9 + $0x18] sm:$0xff] }
 0x101   : > { %vm379_vm2 = vcmp.lt.f32.partialorder %v378_v54, 0.0004427343  ;;  %vm361_vm3 = vcmp.lt.f32.partialorder %v360_v55, 0.0004427343  ;;  %v368_v9 = vmul.f32 %v605_v43, %v367_v56  ;;  %vm370_vm4 = vcmp.lt.f32.partialorder %v369_v57, 0.0004427343 }
 0x102   : > { %v386_v15 = vmul.f32 %v607_v45, %v385_v61  ;;  %vm388_vm5 = vcmp.lt.f32.partialorder %v387_v1, 0.0004427343  ;;  %v432_v57 = vld [vmem:[%s742_s9 + $0x10] sm:$0xff] }
 0x107   : > { %v609_v58 = vpop.eup %608 }
 0x108   : > { %v611_v62 = vpop.eup %610  ;;  %v356_v63 = vmul.f32 0.6931472, %v609_v58  ;;  %v312_v58 = vadd.f32 %v703_v21, %v239_v37 }
 0x109   : > { %v613_v3 = vpop.eup %612  ;;  %v374_v4 = vmul.f32 0.6931472, %v611_v62 }
 0x10a   : > { %v615_v6 = vpop.eup %614  ;;  %v362_v7 = vsel %vm361_vm3, %v359_v0, %v356_v63  ;;  %v365_v8 = vmul.f32 0.6931472, %v613_v3  ;;  %v322_v63 = vadd.f32 %v707_v23, %v239_v37  ;;  %vm483_vm3 = vcmask 392192  }
 0x10b   : > { %v380_v10 = vsel %vm379_vm2, %v377_v5, %v374_v4  ;;  %v390_v11 = vadd.f32 %v362_v7, %v326_v60  ;;  %v383_v13 = vmul.f32 0.6931472, %v615_v6  ;;  %vm474_vm2 = vcmask 130048  }
 0x10c   : > { %v392_v18 = vadd.f32 %v380_v10, %v328_v59  ;;  %v371_v24 = vsel %vm370_vm4, %v368_v9, %v365_v8 }
 0x10d   : > { %v394_v25 = vsel %vm330_vm1, %v701_v19, %v390_v11  ;;  %v389_v27 = vsel %vm388_vm5, %v386_v15, %v383_v13  ;;  %v391_v28 = vadd.f32 %v371_v24, %v327_v2  ;;  %v318_v2 = vadd.f32 %v699_v17, %v239_v37 }
 0x10e   : > { %v396_v30 = vsel %vm332_vm6, %v705_v22, %v392_v18  ;;  %446 = vrot.lane.b32.xlu0 %v394_v25, %s633_s6  ;;  %v398_v31 = vadd.f32 1e-10, %v394_v25  ;;  %v393_v32 = vadd.f32 %v389_v27, %v329_v20 }
 0x10f   : > { %450 = vrot.lane.b32.xlu1 %v396_v30, %s633_s6  ;;  %v400_v33 = vadd.f32 1e-10, %v396_v30  ;;  %v395_v34 = vsel %vm331_vm7, %v710_v26, %v391_v28 }
 0x110   : > { %616 = vrsqrt.f32 %v398_v31  ;;  %v397_v19 = vsel %vm333_vm8, %v713_v29, %v393_v32  ;;  %v399_v35 = vadd.f32 1e-10, %v395_v34  ;;  %v308_v29 = vadd.f32 %v697_v16, %v239_v37 }
 0x111   : > { %618 = vrsqrt.f32 %v400_v33  ;;  %v401_v22 = vadd.f32 1e-10, %v397_v19  ;;  %vm404_vm9 = vcmp.eq.f32.partialorder %v398_v31, inf  ;;  %vm406_vm10 = vcmp.eq.f32.partialorder %v398_v31, 0.0 }
 0x112   : > { %620 = vrsqrt.f32 %v399_v35  ;;  %448 = vrot.lane.b32.xlu0 %v395_v34, %s633_s6  ;;  %v407_v12 = vand.u32 2147483648, %v398_v31  ;;  %vm411_vm11 = vcmp.eq.f32.partialorder %v399_v35, inf  ;;  %vm413_vm12 = vcmp.eq.f32.partialorder %v399_v35, 0.0 }
 0x113   : > { %622 = vrsqrt.f32 %v401_v22  ;;  %452 = vrot.lane.b32.xlu1 %v397_v19, %s633_s6  ;;  %v414_v14 = vand.u32 2147483648, %v399_v35  ;;  %vm425_vm13 = vcmp.eq.f32.partialorder %v401_v22, inf  ;;  %vm418_vm14 = vcmp.eq.f32.partialorder %v400_v33, inf }
 0x114   : > { %v421_v49 = vand.u32 2147483648, %v400_v33  ;;  %v428_v52 = vand.u32 2147483648, %v401_v22  ;;  %vm420_vm15 = vcmp.eq.f32.partialorder %v400_v33, 0.0  ;;  %vm427_vm1 = vcmp.eq.f32.partialorder %v401_v22, 0.0 }
 0x11a   : > { %v617_v26 = vpop.eup %616 }
 0x11b   : > { %v619_v38 = vpop.eup %618  ;;  %v403_v39 = vmul.f32 %v617_v26, %v398_v31 }
 0x11c   : > { %v621_v40 = vpop.eup %620  ;;  %v417_v42 = vmul.f32 %v619_v38, %v400_v33 }
 0x11d   : > { %v623_v43 = vpop.eup %622  ;;  %v405_v44 = vsel %vm404_vm9, %v398_v31, %v403_v39  ;;  %v410_v45 = vmul.f32 %v621_v40, %v399_v35 }
 0x11e   : > { %v408_v16 = vsel %vm406_vm10, %v407_v12, %v405_v44  ;;  %v424_v47 = vmul.f32 %v623_v43, %v401_v22  ;;  %v419_v48 = vsel %vm418_vm14, %v400_v33, %v417_v42 }
 0x11f   : > { %v434_v50 = vmul.f32 %v430_v41, %v408_v16  ;;  %v412_v51 = vsel %vm411_vm11, %v399_v35, %v410_v45  ;;  %v422_v56 = vsel %vm420_vm15, %v421_v49, %v419_v48 }
 0x120   : > { %v415_v54 = vsel %vm413_vm12, %v414_v14, %v412_v51  ;;  %v426_v55 = vsel %vm425_vm13, %v401_v22, %v424_v47  ;;  %v436_v1 = vmul.f32 %v432_v57, %v422_v56 }
 0x121   : > { %v438_v59 = vadd.f32 %v434_v50, %v308_v29  ;;  %v435_v60 = vmul.f32 %v431_v46, %v415_v54  ;;  %v429_v61 = vsel %vm427_vm1, %v428_v52, %v426_v55 }
 0x122   : > { %v437_v62 = vmul.f32 %v433_v53, %v429_v61  ;;  %v440_v4 = vadd.f32 %v436_v1, %v318_v2 }
 0x123   : > { %462 = vrot.lane.b32.xlu1 %v438_v59, %s634_s10  ;;  %v439_v0 = vadd.f32 %v435_v60, %v312_v58 }
 0x124   : > { %v441_v3 = vadd.f32 %v437_v62, %v322_v63 }
 0x125   : > { %464 = vrot.lane.b32.xlu0 %v439_v0, %s634_s10 }
 0x127   : > { %468 = vrot.lane.b32.xlu1 %v441_v3, %s634_s10 }
 0x129   : > { %466 = vrot.lane.b32.xlu0 %v440_v4, %s634_s10 }
 0x180   : > { %v447_v21 = vpop.permute.xlu0 %446 }
 0x181   : > { %v451_v5 = vpop.permute.xlu1 %450  ;;  %v475_v23 = vsel %vm474_vm2, %v308_v29, %v447_v21 }
 0x182   : > { %v477_v24 = vsel %vm474_vm2, %v318_v2, %v451_v5 }
 0x184   : > { %v449_v7 = vpop.permute.xlu0 %448 }
 0x185   : > { %v453_v6 = vpop.permute.xlu1 %452  ;;  %v476_v9 = vsel %vm474_vm2, %v312_v58, %v449_v7 }
 0x186   : > { %v478_v20 = vsel %vm474_vm2, %v322_v63, %v453_v6 }
 0x195   : > { %v463_v8 = vpop.permute.xlu1 %462 }
 0x196   : > { %v479_v17 = vsel %vm266_vm0, %v475_v23, %v463_v8 }
 0x197   : > { %v484_v10 = vsel %vm483_vm3, %v479_v17, 0.0  ;;  %v465_v11 = vpop.permute.xlu0 %464 }
 0x198   : > { %488 = vst [vmem:[%s221_s13] sm:$0xff] %v484_v10  ;;  %v480_v13 = vsel %vm266_vm0, %v476_v9, %v465_v11 }
 0x199   : > { %v485_v15 = vsel %vm483_vm3, %v480_v13, 0.0  ;;  %v469_v18 = vpop.permute.xlu1 %468 }
 0x19a   : > { %489 = vst [vmem:[%s221_s13 + $0x8] sm:$0xff] %v485_v15  ;;  %v482_v25 = vsel %vm266_vm0, %v478_v20, %v469_v18 }
 0x19b   : > { %v467_v27 = vpop.permute.xlu0 %466  ;;  %v487_v31 = vsel %vm483_vm3, %v482_v25, 0.0 }
 0x19c   : > { %v481_v28 = vsel %vm266_vm0, %v477_v24, %v467_v27  ;;  %491 = vst [vmem:[%s221_s13 + $0x18] sm:$0xff] %v487_v31 }
 0x19d   : > { %v486_v30 = vsel %vm483_vm3, %v481_v28, 0.0 }
 0x19e   : > { %490 = vst [vmem:[%s221_s13 + $0x10] sm:$0xff] %v486_v30 }
 0x19f PF: > { %s14_s15 = sadd.s32 1, %s630_s15  }
 0x1a0   : > { %p11_p4 = scmp.ge.s32.totalorder %s14_s15, 4  }
 0x1a2   :  { %13 = sbr.rel (!%p11_p4) target bundleno = 1 (0x1), region = 69 }

</bundles_post_ra>
